<compile_context>
chip_gen: v7x
topology: tpu7x:2x2x1
jax: 0.10.0
libtpu: 0.0.40
codegen_flags: <defaults>
</compile_context>

<pallas_src>
from functools import partial

import jax
import jax.numpy as jnp
from jax.experimental import pallas as pl
from jax.experimental.pallas import tpu as pltpu


# ----------------------------------------------------------------------------
# Kernels
# ----------------------------------------------------------------------------

def _dwconv_kernel_channels_on_lanes(*refs, K, dil, pad, lead, out_len, has_halo):
    """Depthwise causal conv tile; channels on the lane axis.

    refs (has_halo=True):  x_ref (tT, tC), halo_ref (HB, tC), w_ref (K, tC),
                           mask_ref (tT, 1), o_ref (tT, tC)
    refs (has_halo=False): x_ref (tT, tC), w_ref, mask_ref, o_ref
    """
    if has_halo:
        x_ref, halo_ref, w_ref, mask_ref, o_ref = refs
    else:
        x_ref, w_ref, mask_ref, o_ref = refs

    x = x_ref[...].astype(jnp.float32)            # single up-cast of the tile
    w = w_ref[...].astype(jnp.float32)            # (K, tC), channels on lanes

    if pad == 0:
        window = x
    elif has_halo:
        t = pl.program_id(2)
        halo = halo_ref[...].astype(jnp.float32)  # rows just before this tile
        # Causal zeros on the first time tile (the clamped halo DMA is unused).
        halo = halo * (t > 0).astype(jnp.float32)
        window = jnp.concatenate([halo, x], axis=0)           # (lead + tT, tC)
    else:
        window = jnp.concatenate(
            [jnp.zeros((lead, x.shape[1]), jnp.float32), x], axis=0)

    acc = jnp.zeros(x.shape, jnp.float32)
    for k in range(K):
        off = k * dil + (lead - pad)              # tap offset inside the window
        if off == lead:
            tap = x                               # unshifted current tile
        else:
            tap = window[off:off + out_len, :]    # in-register sublane shift
        acc = acc + tap * w[k:k + 1, :]           # per-channel weight (lanes)
    acc = acc * mask_ref[...].astype(jnp.float32)  # (tT, 1) timestep mask
    o_ref[...] = acc.astype(o_ref.dtype)


def _dwconv_kernel_time_on_lanes(*refs, K, dil, pad, out_len, use_carry):
    """Depthwise causal conv tile; time on the lane axis (small channel count).

    refs (use_carry=True):  x_ref (C, tT), w_ref (C, K), mask_ref (1, tT),
                            o_ref (C, tT), carry_ref (C, pad) f32 scratch
    refs (use_carry=False): x_ref, w_ref, mask_ref, o_ref
    """
    if use_carry:
        x_ref, w_ref, mask_ref, o_ref, carry_ref = refs
    else:
        x_ref, w_ref, mask_ref, o_ref = refs

    x = x_ref[...].astype(jnp.float32)            # single up-cast of the tile
    w = w_ref[...].astype(jnp.float32)            # (C, K)

    if pad == 0:
        window = x
    elif use_carry:
        t = pl.program_id(1)

        @pl.when(t == 0)
        def _init():                              # causal zeros at sequence start
            carry_ref[...] = jnp.zeros_like(carry_ref)

        window = jnp.concatenate([carry_ref[...], x], axis=1)  # (C, pad + tT)
        carry_ref[...] = x[:, out_len - pad:]     # halo for the next time tile
    else:
        window = jnp.concatenate(
            [jnp.zeros((x.shape[0], pad), jnp.float32), x], axis=1)

    acc = jnp.zeros(x.shape, jnp.float32)
    for k in range(K):
        off = k * dil
        if off == pad:
            tap = x
        else:
            tap = window[:, off:off + out_len]    # in-register lane shift
        acc = acc + tap * w[:, k:k + 1]           # per-channel weight (sublanes)
    acc = acc * mask_ref[...].astype(jnp.float32)  # lane-dense (1, tT) mask
    o_ref[...] = acc.astype(o_ref.dtype)


# ----------------------------------------------------------------------------
# Tiling helpers
# ----------------------------------------------------------------------------

def _pick_time_tile(T, unit, pad, cap, override):
    """Largest tile <= cap that divides T, is a multiple of `unit` and >= pad."""
    def valid(t):
        return 0 < t <= T and T % t == 0 and t % unit == 0 and t >= pad

    if override is not None and valid(override):
        return override
    best = None
    t = unit
    cap = min(cap, T)
    while t <= cap:
        if T % t == 0 and t >= pad:
            best = t
        t += unit
    return best if best is not None else T        # fall back: single time tile


def _pick_channel_tile(C, override):
    if override is not None and C % override == 0 and (
            override % 128 == 0 or override == C):
        return override
    if C % 128 == 0:
        for cand in (512, 384, 256, 128):
            if C % cand == 0:
                return cand
    return C


def _compiler_params(dimension_semantics, vmem_limit_bytes):
    kwargs = dict(dimension_semantics=dimension_semantics)
    if vmem_limit_bytes is not None:
        kwargs["vmem_limit_bytes"] = vmem_limit_bytes
    return pltpu.CompilerParams(**kwargs)


# ----------------------------------------------------------------------------
# Wrappers
# ----------------------------------------------------------------------------

def _conv_channels_on_lanes(seq, weight, mask_bt, *, dil, pad, time_tile,
                            channel_tile, vmem_limit_bytes):
    """Layout (B, T, C): channels on lanes.  Used when C >= 128."""
    B, T, C = seq.shape
    K = weight.shape[-1]

    tC = _pick_channel_tile(C, channel_tile)
    HB = ((pad + 7) // 8) * 8 if pad > 0 else 0   # halo rows, sublane aligned
    tT = _pick_time_tile(T, unit=(HB if HB > 0 else 8), pad=pad, cap=512,
                         override=time_tile)
    nT, nC = T // tT, C // tC
    has_halo = pad > 0 and nT > 1
    lead = HB if has_halo else pad                # rows in front of the tile

    w_kc = jnp.transpose(weight, (1, 0))          # (K, C): channels on lanes
    mask3 = mask_bt.reshape(B, T, 1)

    in_specs = [pl.BlockSpec((pl.Squeezed(), tT, tC), lambda b, c, t: (b, t, c))]
    operands = [seq]
    if has_halo:
        hbpt = tT // HB
        # Small sublane-aligned block of the HB rows preceding the current time
        # tile (clamped to block 0 on the first tile, where it is zeroed).
        in_specs.append(pl.BlockSpec(
            (pl.Squeezed(), HB, tC),
            lambda b, c, t: (b, jnp.maximum(t * hbpt - 1, 0), c)))
        operands.append(seq)                      # same array, halo view
    in_specs.append(pl.BlockSpec((K, tC), lambda b, c, t: (0, c)))
    operands.append(w_kc)
    in_specs.append(pl.BlockSpec((pl.Squeezed(), tT, 1), lambda b, c, t: (b, t, 0)))
    operands.append(mask3)

    kernel = partial(_dwconv_kernel_channels_on_lanes,
                     K=K, dil=dil, pad=pad, lead=lead, out_len=tT,
                     has_halo=has_halo)
    return pl.pallas_call(
        kernel,
        out_shape=jax.ShapeDtypeStruct((B, T, C), seq.dtype),
        grid=(B, nC, nT),
        in_specs=in_specs,
        out_specs=pl.BlockSpec((pl.Squeezed(), tT, tC), lambda b, c, t: (b, t, c)),
        compiler_params=_compiler_params(("parallel", "parallel", "arbitrary"),
                                         vmem_limit_bytes),
    )(*operands)


def _conv_time_on_lanes(seq, weight, mask_bt, *, dil, pad, time_tile,
                        vmem_limit_bytes):
    """Layout (B, C, T): time on lanes (lane-dense stores/mask).  For C < 128."""
    B, T, C = seq.shape
    K = weight.shape[-1]

    tT = _pick_time_tile(T, unit=128, pad=pad, cap=2048, override=time_tile)
    nT = T // tT
    use_carry = pad > 0 and nT > 1                # halo carried in VMEM scratch

    x_t = jnp.transpose(seq, (0, 2, 1))           # (B, C, T)
    mask3 = mask_bt.reshape(B, 1, T)

    in_specs = [
        pl.BlockSpec((pl.Squeezed(), C, tT), lambda b, t: (b, 0, t)),
        pl.BlockSpec((C, K), lambda b, t: (0, 0)),
        pl.BlockSpec((pl.Squeezed(), 1, tT), lambda b, t: (b, 0, t)),
    ]
    scratch = [pltpu.VMEM((C, pad), jnp.float32)] if use_carry else []

    kernel = partial(_dwconv_kernel_time_on_lanes,
                     K=K, dil=dil, pad=pad, out_len=tT, use_carry=use_carry)
    out_t = pl.pallas_call(
        kernel,
        out_shape=jax.ShapeDtypeStruct((B, C, T), seq.dtype),
        grid=(B, nT),
        in_specs=in_specs,
        out_specs=pl.BlockSpec((pl.Squeezed(), C, tT), lambda b, t: (b, 0, t)),
        scratch_shapes=scratch,
        compiler_params=_compiler_params(("parallel", "arbitrary"),
                                         vmem_limit_bytes),
    )(x_t, weight, mask3)
    return jnp.transpose(out_t, (0, 2, 1))


def causal_dw_conv1d(seq, weight, seq_mask=None, *, dilation_rate=1,
                     time_tile=None, channel_tile=None, vmem_limit_bytes=None):
    """seq: (B, T, C); weight: (C, K) depthwise kernel (PyTorch (C,1,K) squeezed).

    Returns (B, T, C), matching CausalDwConv1d.forward.
    """
    B, T, C = seq.shape
    C_w, K = weight.shape
    if C_w != C:
        raise ValueError(f"weight channels {C_w} != input channels {C}")
    pad = dilation_rate * (K - 1)

    if seq_mask is None:
        mask_bt = jnp.ones((B, T), seq.dtype)
    else:
        mask_bt = seq_mask.reshape(B, T).astype(seq.dtype)

    if C >= 128:
        return _conv_channels_on_lanes(
            seq, weight, mask_bt, dil=dilation_rate, pad=pad,
            time_tile=time_tile, channel_tile=channel_tile,
            vmem_limit_bytes=vmem_limit_bytes)
    return _conv_time_on_lanes(
        seq, weight, mask_bt, dil=dilation_rate, pad=pad,
        time_tile=time_tile, vmem_limit_bytes=vmem_limit_bytes)


# ----------------------------------------------------------------------------
# Reference + self-test
# ----------------------------------------------------------------------------

def _reference(seq, weight, seq_mask, dilation_rate):
    """Pure-JAX reference of the PyTorch forward."""
    B, T, C = seq.shape
    K = weight.shape[-1]
    pad = dilation_rate * (K - 1)
    xp = jnp.pad(seq.astype(jnp.float32), ((0, 0), (pad, 0), (0, 0)))
    out = jnp.zeros((B, T, C), jnp.float32)
    for k in range(K):
        s = k * dilation_rate
        out = out + xp[:, s:s + T, :] * weight[:, k].astype(jnp.float32)[None, None, :]
    if seq_mask is not None:
        out = out * seq_mask.reshape(B, T, 1).astype(jnp.float32)
    return out.astype(seq.dtype)


def _run_case(name, *, B, T, C, K, dil, use_mask, time_tile=None,
              channel_tile=None):
    key = jax.random.PRNGKey(0)
    k_x, k_w, k_m = jax.random.split(key, 3)
    limit = (6.0 / (K + K)) ** 0.5                # glorot_uniform-style init
    weight = jax.random.uniform(k_w, (C, K), minval=-limit, maxval=limit,
                                dtype=jnp.float32)
    seq = jax.random.normal(k_x, (B, T, C), dtype=jnp.float32)
    mask = ((jax.random.uniform(k_m, (B, T)) > 0.2).astype(jnp.float32)
            if use_mask else None)

    out = causal_dw_conv1d(seq, weight, mask, dilation_rate=dil,
                           time_tile=time_tile, channel_tile=channel_tile)
    out = jax.block_until_ready(out)

    ref = _reference(seq, weight, mask, dil)
    assert out.shape == (B, T, C), f"{name}: bad shape {out.shape}"
    err = float(jnp.max(jnp.abs(out - ref)))
    assert jnp.allclose(out, ref, atol=1e-5, rtol=1e-5), \
        f"{name}: mismatch vs reference (max abs err {err})"


if __name__ == "__main__":
    # 1) Module-default config (channels=4, kernel_size=17): small-C path,
    #    time on lanes, single time tile, in-kernel causal zero halo.
    _run_case("small_C", B=2, T=16, C=4, K=17, dil=1, use_mask=True)
    # 2) Wide-C config: channels-on-lanes path with time AND channel tiling,
    #    causal halo delivered as a small sublane-aligned halo block.
    _run_case("wide_C_tiled", B=2, T=64, C=256, K=17, dil=1, use_mask=True,
              time_tile=32, channel_tile=128)
    # 3) Small-C with multiple time tiles: carried-halo (VMEM scratch) path.
    _run_case("small_C_tiled", B=2, T=256, C=4, K=17, dil=1, use_mask=True,
              time_tile=128)
    # 4) Dilation > 1, no mask: halo path with dilated taps.
    _run_case("dilated", B=2, T=64, C=256, K=5, dil=2, use_mask=False,
              time_tile=16)
    print("KERNEL_OK")
</pallas_src>

<mosaic_0001>
module attributes {stable_mosaic.version = 11 : i64} {
  func.func @_dwconv_kernel_time_on_lanes(%arg0: i32, %arg1: i32, %arg2: memref<1x4x16xf32, #tpu.memory_space<vmem>>, %arg3: memref<4x17xf32, #tpu.memory_space<vmem>>, %arg4: memref<1x1x16xf32, #tpu.memory_space<vmem>>, %arg5: memref<1x4x16xf32, #tpu.memory_space<vmem>>) attributes {dimension_semantics = [#tpu.dimension_semantics<parallel>, #tpu.dimension_semantics<arbitrary>], iteration_bounds = array<i64: 2, 1>, scalar_prefetch = 0 : i64, scratch_operands = 0 : i64, tpu.core_type = #tpu.core_type<tc>, window_params = [{transform_indices = @transform_0, window_bounds = array<i64: 1, 4, 16>}, {pipeline_mode = #tpu.pipeline_mode<synchronous>, transform_indices = @transform_1, window_bounds = array<i64: 4, 17>}, {transform_indices = @transform_2, window_bounds = array<i64: 1, 1, 16>}, {transform_indices = @transform_3, window_bounds = array<i64: 1, 4, 16>}]} {
    %c0 = arith.constant 0 : index
    %c0_0 = arith.constant 0 : index
    %c0_1 = arith.constant 0 : index
    %0 = vector.load %arg2[%c0, %c0_0, %c0_1] : memref<1x4x16xf32, #tpu.memory_space<vmem>>, vector<1x4x16xf32>
    %1 = vector.shape_cast %0 : vector<1x4x16xf32> to vector<4x16xf32>
    %c0_2 = arith.constant 0 : index
    %c0_3 = arith.constant 0 : index
    %2 = vector.load %arg3[%c0_2, %c0_3] : memref<4x17xf32, #tpu.memory_space<vmem>>, vector<4x17xf32>
    %cst = arith.constant 0.000000e+00 : f32
    %3 = vector.broadcast %cst : f32 to vector<4x16xf32>
    %4 = tpu.concatenate %3, %1 in 1 : vector<4x16xf32>, vector<4x16xf32> -> vector<4x32xf32>
    %cst_4 = arith.constant 0.000000e+00 : f32
    %5 = vector.broadcast %cst_4 : f32 to vector<4x16xf32>
    %6 = vector.extract_strided_slice %4 {offsets = [0, 0], sizes = [4, 16], strides = [1, 1]} : vector<4x32xf32> to vector<4x16xf32>
    %7 = vector.extract_strided_slice %2 {offsets = [0, 0], sizes = [4, 1], strides = [1, 1]} : vector<4x17xf32> to vector<4x1xf32>
    %8 = vector.broadcast %7 : vector<4x1xf32> to vector<4x16xf32>
    %9 = arith.mulf %6, %8 : vector<4x16xf32>
    %10 = arith.addf %5, %9 : vector<4x16xf32>
    %11 = vector.extract_strided_slice %4 {offsets = [0, 1], sizes = [4, 16], strides = [1, 1]} : vector<4x32xf32> to vector<4x16xf32>
    %12 = vector.extract_strided_slice %2 {offsets = [0, 1], sizes = [4, 1], strides = [1, 1]} : vector<4x17xf32> to vector<4x1xf32>
    %13 = vector.broadcast %12 : vector<4x1xf32> to vector<4x16xf32>
    %14 = arith.mulf %11, %13 : vector<4x16xf32>
    %15 = arith.addf %10, %14 : vector<4x16xf32>
    %16 = vector.extract_strided_slice %4 {offsets = [0, 2], sizes = [4, 16], strides = [1, 1]} : vector<4x32xf32> to vector<4x16xf32>
    %17 = vector.extract_strided_slice %2 {offsets = [0, 2], sizes = [4, 1], strides = [1, 1]} : vector<4x17xf32> to vector<4x1xf32>
    %18 = vector.broadcast %17 : vector<4x1xf32> to vector<4x16xf32>
    %19 = arith.mulf %16, %18 : vector<4x16xf32>
    %20 = arith.addf %15, %19 : vector<4x16xf32>
    %21 = vector.extract_strided_slice %4 {offsets = [0, 3], sizes = [4, 16], strides = [1, 1]} : vector<4x32xf32> to vector<4x16xf32>
    %22 = vector.extract_strided_slice %2 {offsets = [0, 3], sizes = [4, 1], strides = [1, 1]} : vector<4x17xf32> to vector<4x1xf32>
    %23 = vector.broadcast %22 : vector<4x1xf32> to vector<4x16xf32>
    %24 = arith.mulf %21, %23 : vector<4x16xf32>
    %25 = arith.addf %20, %24 : vector<4x16xf32>
    %26 = vector.extract_strided_slice %4 {offsets = [0, 4], sizes = [4, 16], strides = [1, 1]} : vector<4x32xf32> to vector<4x16xf32>
    %27 = vector.extract_strided_slice %2 {offsets = [0, 4], sizes = [4, 1], strides = [1, 1]} : vector<4x17xf32> to vector<4x1xf32>
    %28 = vector.broadcast %27 : vector<4x1xf32> to vector<4x16xf32>
    %29 = arith.mulf %26, %28 : vector<4x16xf32>
    %30 = arith.addf %25, %29 : vector<4x16xf32>
    %31 = vector.extract_strided_slice %4 {offsets = [0, 5], sizes = [4, 16], strides = [1, 1]} : vector<4x32xf32> to vector<4x16xf32>
    %32 = vector.extract_strided_slice %2 {offsets = [0, 5], sizes = [4, 1], strides = [1, 1]} : vector<4x17xf32> to vector<4x1xf32>
    %33 = vector.broadcast %32 : vector<4x1xf32> to vector<4x16xf32>
    %34 = arith.mulf %31, %33 : vector<4x16xf32>
    %35 = arith.addf %30, %34 : vector<4x16xf32>
    %36 = vector.extract_strided_slice %4 {offsets = [0, 6], sizes = [4, 16], strides = [1, 1]} : vector<4x32xf32> to vector<4x16xf32>
    %37 = vector.extract_strided_slice %2 {offsets = [0, 6], sizes = [4, 1], strides = [1, 1]} : vector<4x17xf32> to vector<4x1xf32>
    %38 = vector.broadcast %37 : vector<4x1xf32> to vector<4x16xf32>
    %39 = arith.mulf %36, %38 : vector<4x16xf32>
    %40 = arith.addf %35, %39 : vector<4x16xf32>
    %41 = vector.extract_strided_slice %4 {offsets = [0, 7], sizes = [4, 16], strides = [1, 1]} : vector<4x32xf32> to vector<4x16xf32>
    %42 = vector.extract_strided_slice %2 {offsets = [0, 7], sizes = [4, 1], strides = [1, 1]} : vector<4x17xf32> to vector<4x1xf32>
    %43 = vector.broadcast %42 : vector<4x1xf32> to vector<4x16xf32>
    %44 = arith.mulf %41, %43 : vector<4x16xf32>
    %45 = arith.addf %40, %44 : vector<4x16xf32>
    %46 = vector.extract_strided_slice %4 {offsets = [0, 8], sizes = [4, 16], strides = [1, 1]} : vector<4x32xf32> to vector<4x16xf32>
    %47 = vector.extract_strided_slice %2 {offsets = [0, 8], sizes = [4, 1], strides = [1, 1]} : vector<4x17xf32> to vector<4x1xf32>
    %48 = vector.broadcast %47 : vector<4x1xf32> to vector<4x16xf32>
    %49 = arith.mulf %46, %48 : vector<4x16xf32>
    %50 = arith.addf %45, %49 : vector<4x16xf32>
    %51 = vector.extract_strided_slice %4 {offsets = [0, 9], sizes = [4, 16], strides = [1, 1]} : vector<4x32xf32> to vector<4x16xf32>
    %52 = vector.extract_strided_slice %2 {offsets = [0, 9], sizes = [4, 1], strides = [1, 1]} : vector<4x17xf32> to vector<4x1xf32>
    %53 = vector.broadcast %52 : vector<4x1xf32> to vector<4x16xf32>
    %54 = arith.mulf %51, %53 : vector<4x16xf32>
    %55 = arith.addf %50, %54 : vector<4x16xf32>
    %56 = vector.extract_strided_slice %4 {offsets = [0, 10], sizes = [4, 16], strides = [1, 1]} : vector<4x32xf32> to vector<4x16xf32>
    %57 = vector.extract_strided_slice %2 {offsets = [0, 10], sizes = [4, 1], strides = [1, 1]} : vector<4x17xf32> to vector<4x1xf32>
    %58 = vector.broadcast %57 : vector<4x1xf32> to vector<4x16xf32>
    %59 = arith.mulf %56, %58 : vector<4x16xf32>
    %60 = arith.addf %55, %59 : vector<4x16xf32>
    %61 = vector.extract_strided_slice %4 {offsets = [0, 11], sizes = [4, 16], strides = [1, 1]} : vector<4x32xf32> to vector<4x16xf32>
    %62 = vector.extract_strided_slice %2 {offsets = [0, 11], sizes = [4, 1], strides = [1, 1]} : vector<4x17xf32> to vector<4x1xf32>
    %63 = vector.broadcast %62 : vector<4x1xf32> to vector<4x16xf32>
    %64 = arith.mulf %61, %63 : vector<4x16xf32>
    %65 = arith.addf %60, %64 : vector<4x16xf32>
    %66 = vector.extract_strided_slice %4 {offsets = [0, 12], sizes = [4, 16], strides = [1, 1]} : vector<4x32xf32> to vector<4x16xf32>
    %67 = vector.extract_strided_slice %2 {offsets = [0, 12], sizes = [4, 1], strides = [1, 1]} : vector<4x17xf32> to vector<4x1xf32>
    %68 = vector.broadcast %67 : vector<4x1xf32> to vector<4x16xf32>
    %69 = arith.mulf %66, %68 : vector<4x16xf32>
    %70 = arith.addf %65, %69 : vector<4x16xf32>
    %71 = vector.extract_strided_slice %4 {offsets = [0, 13], sizes = [4, 16], strides = [1, 1]} : vector<4x32xf32> to vector<4x16xf32>
    %72 = vector.extract_strided_slice %2 {offsets = [0, 13], sizes = [4, 1], strides = [1, 1]} : vector<4x17xf32> to vector<4x1xf32>
    %73 = vector.broadcast %72 : vector<4x1xf32> to vector<4x16xf32>
    %74 = arith.mulf %71, %73 : vector<4x16xf32>
    %75 = arith.addf %70, %74 : vector<4x16xf32>
    %76 = vector.extract_strided_slice %4 {offsets = [0, 14], sizes = [4, 16], strides = [1, 1]} : vector<4x32xf32> to vector<4x16xf32>
    %77 = vector.extract_strided_slice %2 {offsets = [0, 14], sizes = [4, 1], strides = [1, 1]} : vector<4x17xf32> to vector<4x1xf32>
    %78 = vector.broadcast %77 : vector<4x1xf32> to vector<4x16xf32>
    %79 = arith.mulf %76, %78 : vector<4x16xf32>
    %80 = arith.addf %75, %79 : vector<4x16xf32>
    %81 = vector.extract_strided_slice %4 {offsets = [0, 15], sizes = [4, 16], strides = [1, 1]} : vector<4x32xf32> to vector<4x16xf32>
    %82 = vector.extract_strided_slice %2 {offsets = [0, 15], sizes = [4, 1], strides = [1, 1]} : vector<4x17xf32> to vector<4x1xf32>
    %83 = vector.broadcast %82 : vector<4x1xf32> to vector<4x16xf32>
    %84 = arith.mulf %81, %83 : vector<4x16xf32>
    %85 = arith.addf %80, %84 : vector<4x16xf32>
    %86 = vector.extract_strided_slice %2 {offsets = [0, 16], sizes = [4, 1], strides = [1, 1]} : vector<4x17xf32> to vector<4x1xf32>
    %87 = vector.broadcast %86 : vector<4x1xf32> to vector<4x16xf32>
    %88 = arith.mulf %1, %87 : vector<4x16xf32>
    %89 = arith.addf %85, %88 : vector<4x16xf32>
    %c0_5 = arith.constant 0 : index
    %c0_6 = arith.constant 0 : index
    %c0_7 = arith.constant 0 : index
    %90 = vector.load %arg4[%c0_5, %c0_6, %c0_7] : memref<1x1x16xf32, #tpu.memory_space<vmem>>, vector<1x1x16xf32>
    %91 = vector.shape_cast %90 : vector<1x1x16xf32> to vector<1x16xf32>
    %92 = vector.broadcast %91 : vector<1x16xf32> to vector<4x16xf32>
    %93 = arith.mulf %89, %92 : vector<4x16xf32>
    %c0_8 = arith.constant 0 : index
    %c0_9 = arith.constant 0 : index
    %c0_10 = arith.constant 0 : index
    %94 = vector.load %arg5[%c0_8, %c0_9, %c0_10] : memref<1x4x16xf32, #tpu.memory_space<vmem>>, vector<1x4x16xf32>
    %95 = vector.shape_cast %94 : vector<1x4x16xf32> to vector<4x16xf32>
    %96 = vector.shape_cast %93 : vector<4x16xf32> to vector<1x4x16xf32>
    tpu.vector_store %arg5[%c0_8, %c0_9, %c0_10], %96 {strides = array<i32>} : memref<1x4x16xf32, #tpu.memory_space<vmem>>, vector<1x4x16xf32>,
    return
  }
  func.func @transform_0(%arg0: i32, %arg1: i32) -> (i32, i32, i32) {
    %c0_i32 = arith.constant 0 : i32
    %c0_i32_0 = arith.constant 0 : i32
    return %arg0, %c0_i32, %arg1 : i32, i32, i32
  }
  func.func @transform_1(%arg0: i32, %arg1: i32) -> (i32, i32) {
    %c0_i32 = arith.constant 0 : i32
    %c0_i32_0 = arith.constant 0 : i32
    %c0_i32_1 = arith.constant 0 : i32
    return %c0_i32, %c0_i32_0 : i32, i32
  }
  func.func @transform_2(%arg0: i32, %arg1: i32) -> (i32, i32, i32) {
    %c0_i32 = arith.constant 0 : i32
    %c0_i32_0 = arith.constant 0 : i32
    return %arg0, %c0_i32, %arg1 : i32, i32, i32
  }
  func.func @transform_3(%arg0: i32, %arg1: i32) -> (i32, i32, i32) {
    %c0_i32 = arith.constant 0 : i32
    %c0_i32_0 = arith.constant 0 : i32
    return %arg0, %c0_i32, %arg1 : i32, i32, i32
  }
}

</mosaic_0001>

<bundles_post_ra>
// kernel: tpu_custom_call.1
= control target key start
LH: loop header
LB: loop body
LE: loop exit
PB: predicated region body
PF: predicated region fallthrough
CT: control target
= control target key end

     0   :  { %8 = vsyncpa [#allocation3], 0  ;;  %s1129_s0 = inlined_call_operand.hbm [shape: f32[2,4,16], index: 0, kind: input, shape index: {}]   ;;  %s1130_s1 = inlined_call_operand.hbm [shape: f32[4,17], index: 1, kind: input, shape index: {}]   ;;  %s1131_s2 = inlined_call_operand.vmem [shape: f32[2,1,16], index: 2, kind: input, shape index: {}]   ;;  %s1132_s3 = inlined_call_operand.hbm [shape: f32[2,4,16], index: 3, kind: output, shape index: {}]  }
   0x1   :  { %10 = vsyncpa [#allocation3 + $0x1], 0 }
   0x2   :  { %11 = vsyncpa [#allocation6], 0 }
   0x3   :  { %12 = vsyncpa [#allocation4], 0 }
   0x4   :  { %14 = vsyncpa [#allocation4 + $0x1], 0  ;;  %s881_s12 = smov 0   ;;  %s883_s13 = smov 0  }
   0x5   :  { %s885_s14 = smov 0   ;;  %s887_s15 = smov 0  }
   0x6   :  { %s889_s16 = smov 0   ;;  %s891_s17 = smov 0  }
   0x7 LB: > { %s539_s18 = sadd.s32 4294967295, %s823_s17   ;;  %s540_s19 = sadd.s32 4294967294, %s823_s17   ;;  %s823_s17 = sphi %s891_s17, %s20_s17   ;;  %s819_s16 = sphi %s889_s16, %s1157_s16   ;;  %s815_s15 = sphi %s887_s15, %s1156_s15   ;;  %s811_s14 = sphi %s885_s14, %s1155_s14   ;;  %s807_s13 = sphi %s883_s13, %s1154_s13   ;;  %s803_s12 = sphi %s881_s12, %s1153_s12  }
   0x8   : > { %p54_p0 = scmp.ne.s32.totalorder %s807_s13, %s803_s12  ;;  %p915_p1 = scmp.eq.s32.totalorder %s539_s18, 0 }
   0x9   : > { %p919_p2 = scmp.eq.s32.totalorder %s539_s18, 1  ;;  %p135_p3 = scmp.eq.s32.totalorder %s540_s19, 1 }
   0xa   : > { %s1137_s20 = scalar_select %p915_p1, 1, 0 }
   0xb   : > { %s1138_s21 = scalar_select %p919_p2, 1, 0 }
   0xc   : > { %p925_p4 = por %p915_p1, %p54_p0  ;;  %p541_p5 = scmp.ge.s32.totalorder %s823_s17, 1 }
   0xd   : > { %p930_p6 = por %p135_p3, %p54_p0  ;;  %p142_p7 = scmp.lt.s32.totalorder %s823_s17, 3 }
   0xe   : > { %s1139_s22 = scalar_select %p925_p4, 1, 0 }
   0xf   : > { %s1140_s23 = scalar_select %p930_p6, 1, 0 }
  0x10   : > { %p935_p8 = pnand %p541_p5, %p142_p7  ;;  %s825_s25 = smov [#allocation5]  }
  0x11   : > { %s155_s26 = sshll.u32 %s825_s25, 4  ;;  %s32_s28 = sadd.s32 1, %s819_s16  ;;  %s156_s26 = int_to_ptr.vmem [resolvable:$true] %s155_s26 }
  0x12   : > { %s1141_s24 = scalar_select %p935_p8, 1, 0 }
  0x13   : > { %p563_p10 = pneg %p935_p8  ;;  %s41_s29 = sadd.s32 1, %s811_s14 }
  0x14   : > { %p950_p12 = scmp.ge.s32.totalorder %s32_s28, 2  ;;  %s679_s6 = scalar_lea.hbm %s1130_s1, 64 }
  0x15   : > { %p944_p11 = pnand %p563_p10, %p915_p1  ;;  %p680_p13 = scmp.ne.s32.totalorder %s1130_s1, %s679_s6 }
  0x16   : > { %s1143_s30 = scalar_select %p950_p12, 1, 0 }
  0x17   : > { %p681_p0 = pneg %p944_p11  ;;  %p686_p7 = scmp.lt.u32.totalorder %s679_s6, %s1130_s1 }
  0x19   : > { %p682_p3 = pnand %p681_p0, %p680_p13 }
  0x1b   : > { %p683_p5 = pneg %p682_p3 }
  0x1d   : > { %p688_p10 = pnand %p686_p7, %p683_p5 }
  0x1f   : > { %691 = shalt.err (!%p688_p10)
}
  0x20   : > { %s692_s11 = scalar_lea.vmem %s156_s26, 64  ;;  %p700_p4 = scmp.lt.s32.totalorder %s156_s26, %s156_s26 }
  0x21   : > { %p693_p9 = scmp.ne.s32.totalorder %s156_s26, %s692_s11  ;;  %p701_p8 = scmp.lt.s32.totalorder %s692_s11, %s692_s11 }
  0x23   : > { %p695_p6 = pnand %p693_p9, %p681_p0  ;;  %p702_p2 = por %p701_p8, %p700_p4 }
  0x25   : > { %p696_p1 = pneg %p695_p6 }
  0x27   : > { %p703_p12 = pnand %p702_p2, %p696_p1 }
  0x29   : > { %706 = shalt.err (!%p703_p12)
}
  0x2a   : > { %566 = dma.hbm_to_vmem [thread:$0]  (!%p944_p11), %s1130_s1, 64, %s156_s26, [#allocation6]  }
  0x2b   : > { %p1144_p4 = scmp.ne.s32.totalorder %s1143_s30, 0  ;;  %p48_p1 = scmp.ne.s32.totalorder %s811_s14, %s807_s13 }
  0x2c   : > { %p49_p2 = scmp.eq.s32.totalorder %s823_s17, 0  ;;  %p576_p6 = scmp.lt.s32.totalorder %s823_s17, 2 }
  0x2d   : > { %s1159_s28 = smov (%p1144_p4, %s32_s28), 0  ;;  %p1145_p12 = scmp.ne.s32.totalorder %s1138_s21, 0 }
  0x2e   : > { %s36_s25 = ssub.s32 %s819_s16, %s1159_s28  ;;  %p50_p9 = por %p49_p2, %p48_p1 }
  0x2f   : > { %p39_p8 = scmp.eq.s32.totalorder %s36_s25, 0  ;;  %p982_p13 = por %p1145_p12, %p48_p1 }
  0x30   : > { %s166_s4 = sand.u32 1, %s811_s14   ;;  %s545_s30 = sshll.u32 %s819_s16, 6 }
  0x31   : > { %s990_s5 = scalar_select %p39_p8, %s811_s14, %s41_s29  }
  0x32   : > { %s544_s26 = sshll.u32 %s166_s4, 2  ;;  %s996_s8 = scalar_lea.hbm %s1129_s0, %s545_s30 }
  0x33   : > { %s170_s21 = scalar_lea.vmem [#allocation2], %s544_s26  ;;  %p1000_p11 = pnand %p576_p6, %p50_p9 }
  0x34   : > { %s178_s9 = sshll.u32 %s170_s21, 4  ;;  %s167_s29 = scalar_lea.sflag [#allocation3], %s166_s4  ;;  %s998_s9 = int_to_ptr.vmem [resolvable:$true] %s178_s9 }
  0x35   : > { %s707_s11 = scalar_lea.hbm %s996_s8, 64  ;;  %p709_p3 = pneg %p1000_p11 }
  0x36   : > { %p708_p0 = scmp.ne.s32.totalorder %s996_s8, %s707_s11  ;;  %s712_s25 = scalar_lea.hbm %s1129_s0, 128 }
  0x37   : > { %p713_p10 = scmp.lt.u32.totalorder %s996_s8, %s1129_s0  ;;  %p714_p4 = scmp.lt.u32.totalorder %s712_s25, %s707_s11 }
  0x38   : > { %p710_p5 = pnand %p709_p3, %p708_p0  ;;  %p716_p2 = scmp.lt.u32.totalorder %s707_s11, %s996_s8 }
  0x39   : > { %p715_p1 = por %p714_p4, %p713_p10 }
  0x3a   : > { %p711_p7 = pneg %p710_p5 }
  0x3b   : > { %p717_p6 = por %p716_p2, %p715_p1 }
  0x3d   : > { %p718_p8 = pnand %p717_p6, %p711_p7 }
  0x3f   : > { %721 = shalt.err (!%p718_p8)
}
  0x40   : > { %s722_s4 = scalar_lea.vmem %s998_s9, 64  ;;  %s826_s6 = smov [#allocation2]  }
  0x41   : > { %p723_p9 = scmp.ne.s32.totalorder %s998_s9, %s722_s4  ;;  %s727_s7 = sshll.u32 %s826_s6, 4  ;;  %s728_s7 = int_to_ptr.vmem [resolvable:$false] %s727_s7 }
  0x42   : > { %s729_s21 = scalar_lea.vmem %s728_s7, 128  ;;  %p730_p5 = scmp.lt.s32.totalorder %s998_s9, %s728_s7 }
  0x43   : > { %p725_p12 = pnand %p723_p9, %p709_p3  ;;  %p731_p10 = scmp.lt.s32.totalorder %s729_s21, %s722_s4 }
  0x45   : > { %p726_p0 = pneg %p725_p12  ;;  %p732_p4 = por %p731_p10, %p730_p5 }
  0x47   : > { %p733_p1 = pnand %p732_p4, %p726_p0 }
  0x49   : > { %736 = shalt.err (!%p733_p1)
}
  0x4a   : > { %570 = dma.hbm_to_vmem [thread:$0]  (!%p1000_p11), %s996_s8, 64, %s998_s9, %s167_s29  }
  0x4b   : > { %p1148_p7 = scmp.ne.s32.totalorder %s1141_s24, 0 }
  0x4c   : > { %s1032_s11 = sand.u32 (!%p1148_p7), 1, %s807_s13   ;;  %p1149_p3 = scmp.ne.s32.totalorder (!%p1148_p7), %s1139_s22, 0 }
  0x4d   : > { %196 = sbr.rel (%p1148_p7) target bundleno = 408 (0x198), region = 32  ;;  %s547_s18 = sshll.u32 (!%p1148_p7), %s1032_s11, 2 }
  0x4e   : > { %s199_s19 = scalar_lea.sflag (!%p1148_p7), [#allocation3], %s1032_s11  ;;  %s202_s25 = scalar_lea.vmem (!%p1148_p7), [#allocation2], %s547_s18 }
  0x54   : > { %790 = dma.done.wait (%p1149_p3), %s199_s19, 64  }
  0x55   : > { %792 = vsyncadd (%p1149_p3), %s199_s19, 4294967232  ;;  %p1150_p11 = scmp.ne.s32.totalorder %s1137_s20, 0 }
  0x57   : > { %794 = dma.done.wait (%p1150_p11), [#allocation6], 64  }
  0x58   : > { %796 = vsyncadd (%p1150_p11), [#allocation6], 4294967232  ;;  %v827_v0 = vmov 3   ;;  %v828_v1 = vmov 1   ;;  %v1046_v2 = vld [vmem:[#allocation5] sm:$0xf] }
  0x59   : > { %663 = vset.pattern.permute.xlu1 %v827_v0  ;;  %661 = vset.pattern.permute.xlu0 %v828_v1  ;;  %v1050_v3 = vld [vmem:[%s202_s25] sm:$0xf]  ;;  %v829_v4 = vmov 2   ;;  %s830_s22 = smov 16   ;;  %v831_v5 = vmov 4   ;;  %v832_v6 = vmov 5  }
  0x5a   : > { %277 = vperm.xlu1 %663, %v1046_v2   ;;  %257 = vperm.xlu0 %661, %v1046_v2   ;;  %v833_v7 = vmov 6   ;;  %v834_v8 = vmov 8   ;;  %v835_v9 = vmov 7   ;;  %v836_v10 = vmov 11   ;;  %s845_s20 = smov 126   ;;  %s846_s24 = smov 127  }
  0x5b   : > { %v837_v11 = vmov 9   ;;  %v838_v12 = vmov 14   ;;  %v839_v13 = vmov 10   ;;  %v840_v14 = vmov 12   ;;  %s847_s8 = smov 125   ;;  %s848_s9 = smov 124  }
  0x5c   : > { %v841_v15 = vmov 16   ;;  %v842_v16 = vmov 13   ;;  %v843_v17 = vmov 15   ;;  %v844_v18 = vmov 0   ;;  %s849_s10 = smov 123   ;;  %s850_s29 = smov 122  }
  0x5d   : > { %vm247_vm0 = vcmask 130048   ;;  %s851_s26 = smov 120   ;;  %s852_s30 = smov 121   ;;  %vm420_vm1 = vcmask 125952  }
  0x5e   : > { %662 = vset.pattern.permute.xlu0 %v829_v4  ;;  %244 = vrot.lane.b32.xlu1 %v1050_v3, %s830_s22  ;;  %s853_s4 = smov 119   ;;  %s854_s6 = smov 117  }
  0x5f   : > { %267 = vperm.xlu0 %662, %v1046_v2   ;;  %664 = vset.pattern.permute.xlu1 %v831_v5  ;;  %s855_s7 = smov 118   ;;  %s856_s21 = smov 116  }
  0x60   : > { %s857_s19 = smov 114   ;;  %s858_s25 = smov 115  }
  0x61   : > { %s859_s22 = smov 113   ;;  %p235_p2 = scmp.lt.s32.totalorder %s815_s15, 1 }
  0x62   : > { %287 = vperm.xlu1 %664, %v1046_v2  }
  0x63   : > { %665 = vset.pattern.permute.xlu0 %v832_v6 }
  0x64   : > { %297 = vperm.xlu0 %665, %v1046_v2  }
  0x66   : > { %666 = vset.pattern.permute.xlu1 %v833_v7 }
  0x67   : > { %307 = vperm.xlu1 %666, %v1046_v2  }
  0x68   : > { %668 = vset.pattern.permute.xlu0 %v834_v8 }
  0x69   : > { %327 = vperm.xlu0 %668, %v1046_v2  }
  0x6b   : > { %667 = vset.pattern.permute.xlu1 %v835_v9 }
  0x6c   : > { %317 = vperm.xlu1 %667, %v1046_v2  }
  0x6d   : > { %671 = vset.pattern.permute.xlu0 %v836_v10 }
  0x6e   : > { %357 = vperm.xlu0 %671, %v1046_v2  }
  0x70   : > { %669 = vset.pattern.permute.xlu1 %v837_v11 }
  0x71   : > { %337 = vperm.xlu1 %669, %v1046_v2  }
  0x72   : > { %674 = vset.pattern.permute.xlu0 %v838_v12 }
  0x73   : > { %387 = vperm.xlu0 %674, %v1046_v2  }
  0x75   : > { %670 = vset.pattern.permute.xlu1 %v839_v13 }
  0x76   : > { %347 = vperm.xlu1 %670, %v1046_v2  }
  0x77   : > { %678 = vset.pattern.permute.xlu0 %v841_v15 }
  0x7a   : > { %672 = vset.pattern.permute.xlu1 %v840_v14 }
  0x7b   : > { %367 = vperm.xlu1 %672, %v1046_v2  }
  0x7f   : > { %673 = vset.pattern.permute.xlu1 %v842_v16 }
  0x80   : > { %377 = vperm.xlu1 %673, %v1046_v2  }
  0x84   : > { %675 = vset.pattern.permute.xlu1 %v843_v17 }
  0x85   : > { %397 = vperm.xlu1 %675, %v1046_v2  }
  0x89   : > { %676 = vset.pattern.permute.xlu1 %v844_v18 }
  0x8a   : > { %251 = vperm.xlu1 %676, %v1046_v2  }
  0x8e   : > { %677 = vset.pattern.permute.xlu1 %v841_v15 }
  0xd9   : > { %v278_v19 = vpop.permute.xlu1 %277  ;;  %v258_v20 = vpop.permute.xlu0 %257 }
  0xdd   : > { %v245_v21 = vpop.permute.xlu1 %244 }
  0xde   : > { %v248_v22 = vsel %vm247_vm0, 0.0, %v245_v21  ;;  %v268_v23 = vpop.permute.xlu0 %267 }
  0xdf   : > { %v270_v24 = vmul.f32 %v268_v23, %v248_v22  ;;  %v260_v25 = vmul.f32 %v258_v20, %v248_v22  ;;  %v280_v29 = vmul.f32 %v278_v19, %v248_v22 }
  0xe1   : > { %272 = vrot.lane.b32.xlu1 %v270_v24, %s845_s20  ;;  %262 = vrot.lane.b32.xlu0 %v260_v25, %s846_s24  ;;  %v288_v26 = vpop.permute.xlu1 %287  ;;  %s236_s20 = scalar_select %p235_p2, %s815_s15, 1 }
  0xe2   : > { %v290_v27 = vmul.f32 %v288_v26, %v248_v22 }
  0xe3   : > { %v298_v28 = vpop.permute.xlu0 %297 }
  0xe4   : > { %v300_v31 = vmul.f32 %v298_v28, %v248_v22 }
  0xe5   : > { %282 = vrot.lane.b32.xlu0 %v280_v29, %s847_s8  ;;  %292 = vrot.lane.b32.xlu1 %v290_v27, %s848_s9  ;;  %s240_s9 = scalar_lea.vmem %s1131_s2, %s236_s20 }
  0xe6   : > { %v308_v30 = vpop.permute.xlu1 %307 }
  0xe7   : > { %v310_v32 = vmul.f32 %v308_v30, %v248_v22 }
  0xe8   : > { %v328_v33 = vpop.permute.xlu0 %327 }
  0xe9   : > { %302 = vrot.lane.b32.xlu0 %v300_v31, %s849_s10  ;;  %312 = vrot.lane.b32.xlu1 %v310_v32, %s850_s29  ;;  %v330_v34 = vmul.f32 %v328_v33, %v248_v22  ;;  %s552_s10 = sshll.u32 %s815_s15, 6  ;;  %s234_s29 = scalar_lea.vmem [#allocation7], %s547_s18 }
  0xea   : > { %s860_s15 = smov [#allocation7]  }
  0xeb   : > { %v318_v35 = vpop.permute.xlu1 %317  ;;  %s741_s18 = sshll.u32 %s860_s15, 4  ;;  %s742_s18 = int_to_ptr.vmem [resolvable:$false] %s741_s18 }
  0xec   : > { %v320_v36 = vmul.f32 %v318_v35, %v248_v22 }
  0xed   : > { %332 = vrot.lane.b32.xlu1 %v330_v34, %s851_s26  ;;  %v358_v39 = vpop.permute.xlu0 %357  ;;  %s437_s26 = sshll.u32 %s234_s29, 4  ;;  %s1082_s26 = int_to_ptr.vmem [resolvable:$true] %s437_s26 }
  0xee   : > { %322 = vrot.lane.b32.xlu0 %v320_v36, %s852_s30  ;;  %v360_v40 = vmul.f32 %v358_v39, %v248_v22  ;;  %p744_p12 = scmp.lt.s32.totalorder %s1082_s26, %s742_s18 }
  0xf0   : > { %v338_v37 = vpop.permute.xlu1 %337 }
  0xf1   : > { %v340_v38 = vmul.f32 %v338_v37, %v248_v22 }
  0xf2   : > { %v388_v45 = vpop.permute.xlu0 %387 }
  0xf3   : > { %342 = vrot.lane.b32.xlu0 %v340_v38, %s853_s4  ;;  %v390_v46 = vmul.f32 %v388_v45, %v248_v22 }
  0xf5   : > { %v348_v41 = vpop.permute.xlu1 %347 }
  0xf6   : > { %v350_v42 = vmul.f32 %v348_v41, %v248_v22 }
  0xf7   : > { %362 = vrot.lane.b32.xlu0 %v360_v40, %s854_s6  ;;  %s1080_s6 = scalar_lea.hbm %s1132_s3, %s552_s10 }
  0xf8   : > { %352 = vrot.lane.b32.xlu1 %v350_v42, %s855_s7  ;;  %s423_s7 = scalar_lea.sflag [#allocation4], %s1032_s11 }
  0xfa   : > { %v368_v43 = vpop.permute.xlu1 %367 }
  0xfb   : > { %v370_v44 = vmul.f32 %v368_v43, %v248_v22 }
  0xfc   : > { %407 = vperm.xlu1 %677, %v1046_v2  }
  0xfd   : > { %372 = vrot.lane.b32.xlu0 %v370_v44, %s856_s21  ;;  %s737_s21 = scalar_lea.vmem %s1082_s26, 64 }
  0xfe   : > { %p738_p6 = scmp.ne.s32.totalorder %s1082_s26, %s737_s21 }
  0xff   : > { %v378_v47 = vpop.permute.xlu1 %377 }
 0x100   : > { %v380_v48 = vmul.f32 %v378_v47, %v248_v22  ;;  %p739_p8 = pnand %p738_p6, %p982_p13 }
 0x101   : > { %392 = vrot.lane.b32.xlu0 %v390_v46, %s857_s19  ;;  %s743_s19 = scalar_lea.vmem %s742_s18, 128 }
 0x102   : > { %382 = vrot.lane.b32.xlu1 %v380_v48, %s858_s25  ;;  %p740_p9 = pneg %p739_p8  ;;  %p745_p0 = scmp.lt.s32.totalorder %s743_s19, %s737_s21 }
 0x104   : > { %v398_v49 = vpop.permute.xlu1 %397  ;;  %p746_p5 = por %p745_p0, %p744_p12 }
 0x105   : > { %v400_v50 = vmul.f32 %v398_v49, %v248_v22 }
 0x106   : > { %p747_p10 = pnand %p746_p5, %p740_p9 }
 0x107   : > { %402 = vrot.lane.b32.xlu1 %v400_v50, %s859_s22 }
 0x109   : > { %v252_v51 = vpop.permute.xlu1 %251 }
 0x10a   : > { %v254_v52 = vmul.f32 %v252_v51, %v248_v22  ;;  %v550_v22 = vld [vmem:[%s240_s9] ss:$0 sm:$0xff] }
 0x153   : > { %v263_v53 = vpop.permute.xlu0 %262  ;;  %v273_v55 = vpop.permute.xlu1 %272 }
 0x154   : > { %v265_v54 = vadd.f32 %v263_v53, %v254_v52 }
 0x156   : > { %v275_v56 = vadd.f32 %v273_v55, %v265_v54 }
 0x157   : > { %v283_v57 = vpop.permute.xlu0 %282  ;;  %v293_v59 = vpop.permute.xlu1 %292 }
 0x158   : > { %v285_v58 = vadd.f32 %v283_v57, %v275_v56 }
 0x15a   : > { %v295_v60 = vadd.f32 %v293_v59, %v285_v58 }
 0x15b   : > { %v303_v61 = vpop.permute.xlu0 %302  ;;  %v313_v63 = vpop.permute.xlu1 %312 }
 0x15c   : > { %v305_v62 = vadd.f32 %v303_v61, %v295_v60 }
 0x15e   : > { %v315_v0 = vadd.f32 %v313_v63, %v305_v62 }
 0x15f   : > { %v333_v4 = vpop.permute.xlu1 %332 }
 0x160   : > { %v323_v1 = vpop.permute.xlu0 %322 }
 0x161   : > { %v325_v2 = vadd.f32 %v323_v1, %v315_v0 }
 0x163   : > { %v335_v5 = vadd.f32 %v333_v4, %v325_v2 }
 0x165   : > { %v343_v6 = vpop.permute.xlu0 %342 }
 0x166   : > { %v345_v8 = vadd.f32 %v343_v6, %v335_v5 }
 0x169   : > { %v363_v10 = vpop.permute.xlu0 %362 }
 0x16a   : > { %v353_v7 = vpop.permute.xlu1 %352 }
 0x16b   : > { %v355_v9 = vadd.f32 %v353_v7, %v345_v8 }
 0x16d   : > { %v365_v11 = vadd.f32 %v363_v10, %v355_v9 }
 0x16f   : > { %v373_v12 = vpop.permute.xlu0 %372 }
 0x170   : > { %v375_v14 = vadd.f32 %v373_v12, %v365_v11 }
 0x173   : > { %v393_v17 = vpop.permute.xlu0 %392 }
 0x17b   : > { %v408_v13 = vpop.permute.xlu1 %407 }
 0x17c   : > { %v410_v20 = vmul.f32 %v408_v13, %v1050_v3 }
 0x17f   : > { %v383_v15 = vpop.permute.xlu1 %382 }
 0x180   : > { %v385_v16 = vadd.f32 %v383_v15, %v375_v14 }
 0x182   : > { %v395_v18 = vadd.f32 %v393_v17, %v385_v16 }
 0x183   : > { %v403_v19 = vpop.permute.xlu1 %402 }
 0x184   : > { %v405_v21 = vadd.f32 %v403_v19, %v395_v18 }
 0x186   : > { %v411_v23 = vadd.f32 %v410_v20, %v405_v21 }
 0x188   : > { %v419_v24 = vmul.f32 %v550_v22, %v411_v23 }
 0x18a   : > { %421 = vst.msk [vmem:[%s234_s29] sm:$0xf] %vm420_vm1, %v419_v24 }
 0x18b   : > { %750 = shalt.err (!%p747_p10)
}
 0x18c   : > { %s751_s11 = scalar_lea.hbm %s1080_s6, 64  ;;  %s755_s20 = scalar_lea.hbm %s1132_s3, 128 }
 0x18d   : > { %p752_p4 = scmp.ne.s32.totalorder %s1080_s6, %s751_s11  ;;  %p756_p3 = scmp.lt.u32.totalorder %s1080_s6, %s1132_s3 }
 0x18e   : > { %p757_p11 = scmp.lt.u32.totalorder %s755_s20, %s751_s11  ;;  %p759_p6 = scmp.lt.u32.totalorder %s751_s11, %s1080_s6 }
 0x18f   : > { %p753_p1 = pnand %p752_p4, %p982_p13 }
 0x190   : > { %p758_p2 = por %p757_p11, %p756_p3 }
 0x191   : > { %p754_p7 = pneg %p753_p1 }
 0x192   : > { %p760_p8 = por %p759_p6, %p758_p2 }
 0x194   : > { %p761_p9 = pnand %p760_p8, %p754_p7 }
 0x196   : > { %764 = shalt.err (!%p761_p9)
}
 0x197   : > { %561 = dma.vmem_to_hbm [thread:$0]  (%p982_p13), %s1082_s26, 64, %s1080_s6, %s423_s7  }
 0x198 PF: > { %s449_s9 = sand.u32 1, %s803_s12   ;;  %p1151_p12 = scmp.ne.s32.totalorder %s1140_s23, 0 }
 0x199   : > { %p1152_p0 = scmp.ge.s32.totalorder %s823_s17, 2  ;;  %s450_s10 = scalar_lea.sflag [#allocation4], %s449_s9 }
 0x19b   : > { %p572_p5 = pnand %p1152_p0, %p1151_p12 }
 0x19d   : > { %798 = dma.done.wait (!%p572_p5), %s450_s10, 64  }
 0x19e   : > { %800 = vsyncadd (!%p572_p5), %s450_s10, 4294967232  ;;  %s20_s17 = sadd.s32 1, %s823_s17   ;;  %s1153_s12 = smov %s807_s13 }
 0x19f   : > { %p17_p10 = scmp.ge.s32.totalorder %s20_s17, 4   ;;  %s1154_s13 = smov %s811_s14 }
 0x1a0   : > { %s1155_s14 = smov %s990_s5  ;;  %s1156_s15 = smov %s819_s16 }
 0x1a1   : > { %s1157_s16 = smov %s1159_s28  ;;  %19 = sbr.rel (!%p17_p10) target bundleno = 7 (0x7), region = 84 }
 0x1a8   :  { %455 = vsyncpa [#allocation3], 1 }
 0x1a9   :  { %457 = vsyncpa [#allocation3 + $0x1], 1 }
 0x1aa   :  { %458 = vsyncpa [#allocation6], 1 }
 0x1ab   :  { %459 = vsyncpa [#allocation4], 1 }
 0x1ac   :  { %461 = vsyncpa [#allocation4 + $0x1], 1 }

</bundles_post_ra>
